<compile_context>
chip_gen: v7x
topology: tpu7x:2x2x1
jax: 0.10.0
libtpu: 0.0.40
codegen_flags: <defaults>
</compile_context>

<pallas_src>
import functools

import jax
import jax.numpy as jnp
from jax.experimental import pallas as pl
from jax.experimental.pallas import tpu as pltpu


def _round_up(x, m):
    return (x + m - 1) // m * m


def _gelu_new(x):
    # GPT-2 "gelu_new" (tanh approximation), matching ACT2FN["gelu_new"].
    # TODO(synk): activation is config-dependent (config.gpt_config.activation_function);
    # gelu_new is the GPT-2 default and is what we implement here.
    c = 0.7978845608028654  # sqrt(2/pi)
    return 0.5 * x * (1.0 + jnp.tanh(c * (x + 0.044715 * x * x * x)))


def _rating_head_kernel(x_ref,
                        w1a_ref, b1a_ref, w1b_ref, b1b_ref,
                        w2a_ref, b2a_ref, w2b_ref, b2b_ref,
                        wd_ref,
                        score_ref, hidden_ref=None):
    """One batch tile: [TB, Dp] in, [TB, 1] raw score (+ optional [TB, Dp] hidden) out."""
    cd = x_ref.dtype  # compute dtype for MXU operands (bf16 by default)

    x = x_ref[...]                                                           # [TB, Dp]

    # ---- nonlinear_1: Linear -> gelu_new -> Linear (dropout = identity) ----
    h = jnp.dot(x, w1a_ref[...], preferred_element_type=jnp.float32) + b1a_ref[...]
    h = _gelu_new(h)
    h = jnp.dot(h.astype(cd), w1b_ref[...], preferred_element_type=jnp.float32) + b1b_ref[...]

    # ---- nonlinear_2 ----
    h = jnp.dot(h.astype(cd), w2a_ref[...], preferred_element_type=jnp.float32) + b2a_ref[...]
    h = _gelu_new(h)
    h = jnp.dot(h.astype(cd), w2b_ref[...], preferred_element_type=jnp.float32) + b2b_ref[...]

    if hidden_ref is not None:
        hidden_ref[...] = h                                                  # [TB, Dp] f32

    # ---- down_proj (Dp -> 1) as a lane reduction (bias/alpha added outside) ----
    score_ref[...] = jnp.sum(h * wd_ref[...], axis=-1, keepdims=True)        # [TB, 1]


def prepare_params(params, compute_dtype=jnp.bfloat16):
    """One-time relayout: Linear weights [out,in] -> [in,out], zero-pad D to a
    multiple of 128 (lane-dense), cast matmul weights to `compute_dtype`."""
    D = params["nl1_c_fc_w"].shape[0]
    Dp = _round_up(D, 128)

    def pad_w(w):  # torch [out, in] -> padded [Dp(in), Dp(out)]
        wt = jnp.asarray(w, jnp.float32).T
        wt = jnp.pad(wt, ((0, Dp - wt.shape[0]), (0, Dp - wt.shape[1])))
        return wt.astype(compute_dtype)

    def pad_b(b):  # -> [1, Dp] f32 (zero-padded -> padded lanes stay exactly 0)
        b = jnp.asarray(b, jnp.float32)
        return jnp.pad(b, (0, Dp - b.shape[0]))[None, :]

    wd = jnp.asarray(params["down_proj_w"], jnp.float32)          # [1, D]
    wd = jnp.pad(wd, ((0, 0), (0, Dp - D)))                       # [1, Dp] f32

    return {
        "user_factor": jnp.asarray(params["user_factor"], jnp.float32),
        "item_factor": jnp.asarray(params["item_factor"], jnp.float32),
        "user_bias":   jnp.asarray(params["user_bias"], jnp.float32),
        "item_bias":   jnp.asarray(params["item_bias"], jnp.float32),
        "w1a": pad_w(params["nl1_c_fc_w"]),  "b1a": pad_b(params["nl1_c_fc_b"]),
        "w1b": pad_w(params["nl1_c_proj_w"]), "b1b": pad_b(params["nl1_c_proj_b"]),
        "w2a": pad_w(params["nl2_c_fc_w"]),  "b2a": pad_b(params["nl2_c_fc_b"]),
        "w2b": pad_w(params["nl2_c_proj_w"]), "b2b": pad_b(params["nl2_c_proj_b"]),
        "wd": wd,
        "bd": jnp.asarray(params["down_proj_b"], jnp.float32).reshape(()),
        "alpha": jnp.asarray(params["alpha"], jnp.float32),
    }


def _vmem_limit_bytes(TB, Dp, w_itemsize, emit_hidden):
    weights = 4 * Dp * Dp * w_itemsize                 # resident across grid
    biases = 4 * Dp * 4 + Dp * 4
    x_buf = 2 * TB * Dp * w_itemsize                   # double-buffered input tile
    score_buf = 2 * TB * 4
    hidden_buf = 2 * TB * Dp * 4 if emit_hidden else 0
    est = weights + biases + x_buf + score_buf + hidden_buf + (4 << 20)
    # Stay within v5e/v6e scoped defaults when small; cap below v7x's 64 MiB physical.
    return int(min(max(est, 32 << 20), 60 << 20))


@functools.partial(jax.jit, static_argnames=("return_hidden",))
def causal_prag_rating_head(prepared, userid, itemid, pooled_hidden_states,
                            return_hidden=False):
    """JAX/Pallas equivalent of CausalPragRatingHead.forward (eval mode)."""
    uf = jnp.take(prepared["user_factor"], userid, axis=0)    # [B, ui]
    itf = jnp.take(prepared["item_factor"], itemid, axis=0)   # [B, ui]
    x = jnp.concatenate(
        [uf, itf, pooled_hidden_states.astype(jnp.float32)], axis=-1)        # [B, D]
    B, D = x.shape
    Dp = prepared["w1a"].shape[0]
    compute_dtype = prepared["w1a"].dtype
    w_itemsize = jnp.dtype(compute_dtype).itemsize

    # Batch tile: lane-dense features (Dp), sublane-aligned batch tile.
    TB = 256 if B >= 256 else _round_up(B, 8)
    Bp = _round_up(B, TB)
    x_p = jnp.pad(x, ((0, Bp - B), (0, Dp - D))).astype(compute_dtype)       # [Bp, Dp]

    grid = (Bp // TB,)
    x_spec = pl.BlockSpec((TB, Dp), lambda i: (i, 0))
    w_spec = pl.BlockSpec((Dp, Dp), lambda i: (0, 0))       # VMEM-resident across steps
    b_spec = pl.BlockSpec((1, Dp), lambda i: (0, 0))
    score_spec = pl.BlockSpec((TB, 1), lambda i: (i, 0))
    hidden_spec = pl.BlockSpec((TB, Dp), lambda i: (i, 0))

    in_specs = [x_spec,
                w_spec, b_spec, w_spec, b_spec,
                w_spec, b_spec, w_spec, b_spec,
                b_spec]  # wd is [1, Dp]

    if return_hidden:
        out_shape = (jax.ShapeDtypeStruct((Bp, 1), jnp.float32),
                     jax.ShapeDtypeStruct((Bp, Dp), jnp.float32))
        out_specs = (score_spec, hidden_spec)
    else:
        out_shape = jax.ShapeDtypeStruct((Bp, 1), jnp.float32)
        out_specs = score_spec

    compiler_params = pltpu.CompilerParams(
        dimension_semantics=("parallel",),  # shard batch grid across v7x's 2 TCs
        vmem_limit_bytes=_vmem_limit_bytes(TB, Dp, w_itemsize, return_hidden))

    args = (x_p,
            prepared["w1a"], prepared["b1a"], prepared["w1b"], prepared["b1b"],
            prepared["w2a"], prepared["b2a"], prepared["w2b"], prepared["b2b"],
            prepared["wd"])

    outs = pl.pallas_call(
        _rating_head_kernel,
        out_shape=out_shape,
        grid=grid,
        in_specs=in_specs,
        out_specs=out_specs,
        compiler_params=compiler_params,
    )(*args)

    if return_hidden:
        raw, hidden = outs
    else:
        raw, hidden = outs, None

    # Scalar / lane-sparse terms folded here (fused by XLA, no kernel cost).
    score = (prepared["alpha"]
             + jnp.take(prepared["user_bias"], userid)
             + jnp.take(prepared["item_bias"], itemid)
             + prepared["bd"]
             + raw[:B, 0])                                                   # [B]

    if return_hidden:
        return score, hidden[:B, :D]
    return score


def init_params(key, nuser, nitem, ui_hidden_size, bert_hidden_size,
                average_rating=3.5):
    D = 2 * ui_hidden_size + bert_hidden_size
    keys = jax.random.split(key, 14)
    n = lambda k, shape, std: std * jax.random.normal(k, shape, jnp.float32)
    return {
        "user_bias":    n(keys[0], (nuser,), 1e-4),
        "item_bias":    n(keys[1], (nitem,), 1e-4),
        "user_factor":  n(keys[2], (nuser, ui_hidden_size), 1e-4),
        "item_factor":  n(keys[3], (nitem, ui_hidden_size), 1e-4),
        "nl1_c_fc_w":   n(keys[4], (D, D), 0.02),
        "nl1_c_fc_b":   n(keys[5], (D,), 0.02),
        "nl1_c_proj_w": n(keys[6], (D, D), 0.02),
        "nl1_c_proj_b": n(keys[7], (D,), 0.02),
        "nl2_c_fc_w":   n(keys[8], (D, D), 0.02),
        "nl2_c_fc_b":   n(keys[9], (D,), 0.02),
        "nl2_c_proj_w": n(keys[10], (D, D), 0.02),
        "nl2_c_proj_b": n(keys[11], (D,), 0.02),
        "down_proj_w":  n(keys[12], (1, D), 0.02),
        "down_proj_b":  n(keys[13], (1,), 0.02),
        "alpha":        average_rating,
    }


def _reference_forward(params, userid, itemid, pooled):
    """Pure-JAX f32 reference (matches the PyTorch module in eval mode)."""
    uf = jnp.take(params["user_factor"], userid, axis=0)
    itf = jnp.take(params["item_factor"], itemid, axis=0)
    x = jnp.concatenate([uf, itf, pooled], axis=-1)
    h = _gelu_new(x @ params["nl1_c_fc_w"].T + params["nl1_c_fc_b"])
    h = h @ params["nl1_c_proj_w"].T + params["nl1_c_proj_b"]
    h = _gelu_new(h @ params["nl2_c_fc_w"].T + params["nl2_c_fc_b"])
    h = h @ params["nl2_c_proj_w"].T + params["nl2_c_proj_b"]
    s = h @ params["down_proj_w"].T + params["down_proj_b"]
    score = (params["alpha"] + jnp.take(params["user_bias"], userid)
             + jnp.take(params["item_bias"], itemid) + s[:, 0])
    return score, h


if __name__ == "__main__":
    # Small, module-consistent shapes.
    B = 8
    nuser, nitem = 10, 12
    ui_hidden_size = 16
    bert_hidden_size = 32   # D = 2*16 + 32 = 64 -> padded to 128 lanes

    key = jax.random.PRNGKey(0)
    kp, ku, ki, kh = jax.random.split(key, 4)

    params = init_params(kp, nuser, nitem, ui_hidden_size, bert_hidden_size,
                         average_rating=3.5)
    prepared = prepare_params(params)   # one-time relayout / pad / bf16 cast

    userid = jax.random.randint(ku, (B,), 0, nuser)
    itemid = jax.random.randint(ki, (B,), 0, nitem)
    pooled = jax.random.normal(kh, (B, bert_hidden_size), jnp.float32)

    score, hidden = causal_prag_rating_head(prepared, userid, itemid, pooled,
                                            return_hidden=True)
    score_only = causal_prag_rating_head(prepared, userid, itemid, pooled,
                                         return_hidden=False)
    jax.block_until_ready((score, hidden, score_only))

    assert score.shape == (B,)
    assert hidden.shape == (B, 2 * ui_hidden_size + bert_hidden_size)
    assert score_only.shape == (B,)
    assert bool(jnp.allclose(score, score_only, atol=1e-6, rtol=1e-6))

    # Sanity vs. f32 reference (bf16 matmuls -> generous tolerance).
    ref_score, ref_hidden = _reference_forward(params, userid, itemid, pooled)
    assert bool(jnp.allclose(score, ref_score, atol=5e-2, rtol=5e-2))
    assert bool(jnp.allclose(hidden, ref_hidden, atol=5e-2, rtol=5e-2))

    print("KERNEL_OK")
</pallas_src>

<mosaic_0001>
module attributes {stable_mosaic.version = 11 : i64} {
  func.func @_rating_head_kernel(%arg0: i32, %arg1: memref<8x128xbf16, #tpu.memory_space<vmem>>, %arg2: memref<128x128xbf16, #tpu.memory_space<vmem>>, %arg3: memref<1x128xf32, #tpu.memory_space<vmem>>, %arg4: memref<128x128xbf16, #tpu.memory_space<vmem>>, %arg5: memref<1x128xf32, #tpu.memory_space<vmem>>, %arg6: memref<128x128xbf16, #tpu.memory_space<vmem>>, %arg7: memref<1x128xf32, #tpu.memory_space<vmem>>, %arg8: memref<128x128xbf16, #tpu.memory_space<vmem>>, %arg9: memref<1x128xf32, #tpu.memory_space<vmem>>, %arg10: memref<1x128xf32, #tpu.memory_space<vmem>>, %arg11: memref<8x1xf32, #tpu.memory_space<vmem>>, %arg12: memref<8x128xf32, #tpu.memory_space<vmem>>) attributes {dimension_semantics = [#tpu.dimension_semantics<parallel>], iteration_bounds = array<i64: 1>, scalar_prefetch = 0 : i64, scratch_operands = 0 : i64, tpu.core_type = #tpu.core_type<tc>, window_params = [{transform_indices = @transform_0, window_bounds = array<i64: 8, 128>}, {pipeline_mode = #tpu.pipeline_mode<synchronous>, transform_indices = @transform_1, window_bounds = array<i64: 128, 128>}, {pipeline_mode = #tpu.pipeline_mode<synchronous>, transform_indices = @transform_2, window_bounds = array<i64: 1, 128>}, {pipeline_mode = #tpu.pipeline_mode<synchronous>, transform_indices = @transform_3, window_bounds = array<i64: 128, 128>}, {pipeline_mode = #tpu.pipeline_mode<synchronous>, transform_indices = @transform_4, window_bounds = array<i64: 1, 128>}, {pipeline_mode = #tpu.pipeline_mode<synchronous>, transform_indices = @transform_5, window_bounds = array<i64: 128, 128>}, {pipeline_mode = #tpu.pipeline_mode<synchronous>, transform_indices = @transform_6, window_bounds = array<i64: 1, 128>}, {pipeline_mode = #tpu.pipeline_mode<synchronous>, transform_indices = @transform_7, window_bounds = array<i64: 128, 128>}, {pipeline_mode = #tpu.pipeline_mode<synchronous>, transform_indices = @transform_8, window_bounds = array<i64: 1, 128>}, {pipeline_mode = #tpu.pipeline_mode<synchronous>, transform_indices = @transform_9, window_bounds = array<i64: 1, 128>}, {transform_indices = @transform_10, window_bounds = array<i64: 8, 1>}, {transform_indices = @transform_11, window_bounds = array<i64: 8, 128>}]} {
    %c0 = arith.constant 0 : index
    %c0_0 = arith.constant 0 : index
    %0 = vector.load %arg1[%c0, %c0_0] : memref<8x128xbf16, #tpu.memory_space<vmem>>, vector<8x128xbf16>
    %c0_1 = arith.constant 0 : index
    %c0_2 = arith.constant 0 : index
    %1 = vector.load %arg2[%c0_1, %c0_2] : memref<128x128xbf16, #tpu.memory_space<vmem>>, vector<128x128xbf16>
    %cst = arith.constant dense<0.000000e+00> : vector<8x128xf32>
    %2 = tpu.matmul %0, %1, %cst {dimension_numbers = #tpu.dot_dimension_numbers<[1], [0], [0], [1], [0, 0, 1, 1], [], []>} : vector<8x128xbf16>, vector<128x128xbf16>, vector<8x128xf32> -> vector<8x128xf32>
    %c0_3 = arith.constant 0 : index
    %c0_4 = arith.constant 0 : index
    %3 = vector.load %arg3[%c0_3, %c0_4] : memref<1x128xf32, #tpu.memory_space<vmem>>, vector<1x128xf32>
    %4 = vector.broadcast %3 : vector<1x128xf32> to vector<8x128xf32>
    %5 = arith.addf %2, %4 : vector<8x128xf32>
    %cst_5 = arith.constant 5.000000e-01 : f32
    %6 = vector.broadcast %cst_5 : f32 to vector<8x128xf32>
    %7 = arith.mulf %6, %5 : vector<8x128xf32>
    %cst_6 = arith.constant 4.471500e-02 : f32
    %8 = vector.broadcast %cst_6 : f32 to vector<8x128xf32>
    %9 = arith.mulf %8, %5 : vector<8x128xf32>
    %10 = arith.mulf %9, %5 : vector<8x128xf32>
    %11 = arith.mulf %10, %5 : vector<8x128xf32>
    %12 = arith.addf %5, %11 : vector<8x128xf32>
    %cst_7 = arith.constant 0.797884583 : f32
    %13 = vector.broadcast %cst_7 : f32 to vector<8x128xf32>
    %14 = arith.mulf %13, %12 : vector<8x128xf32>
    %15 = math.tanh %14 : vector<8x128xf32>
    %cst_8 = arith.constant 1.000000e+00 : f32
    %16 = vector.broadcast %cst_8 : f32 to vector<8x128xf32>
    %17 = arith.addf %16, %15 : vector<8x128xf32>
    %18 = arith.mulf %7, %17 : vector<8x128xf32>
    %19 = arith.truncf %18 : vector<8x128xf32> to vector<8x128xbf16>
    %c0_9 = arith.constant 0 : index
    %c0_10 = arith.constant 0 : index
    %20 = vector.load %arg4[%c0_9, %c0_10] : memref<128x128xbf16, #tpu.memory_space<vmem>>, vector<128x128xbf16>
    %cst_11 = arith.constant dense<0.000000e+00> : vector<8x128xf32>
    %21 = tpu.matmul %19, %20, %cst_11 {dimension_numbers = #tpu.dot_dimension_numbers<[1], [0], [0], [1], [0, 0, 1, 1], [], []>} : vector<8x128xbf16>, vector<128x128xbf16>, vector<8x128xf32> -> vector<8x128xf32>
    %c0_12 = arith.constant 0 : index
    %c0_13 = arith.constant 0 : index
    %22 = vector.load %arg5[%c0_12, %c0_13] : memref<1x128xf32, #tpu.memory_space<vmem>>, vector<1x128xf32>
    %23 = vector.broadcast %22 : vector<1x128xf32> to vector<8x128xf32>
    %24 = arith.addf %21, %23 : vector<8x128xf32>
    %25 = arith.truncf %24 : vector<8x128xf32> to vector<8x128xbf16>
    %c0_14 = arith.constant 0 : index
    %c0_15 = arith.constant 0 : index
    %26 = vector.load %arg6[%c0_14, %c0_15] : memref<128x128xbf16, #tpu.memory_space<vmem>>, vector<128x128xbf16>
    %cst_16 = arith.constant dense<0.000000e+00> : vector<8x128xf32>
    %27 = tpu.matmul %25, %26, %cst_16 {dimension_numbers = #tpu.dot_dimension_numbers<[1], [0], [0], [1], [0, 0, 1, 1], [], []>} : vector<8x128xbf16>, vector<128x128xbf16>, vector<8x128xf32> -> vector<8x128xf32>
    %c0_17 = arith.constant 0 : index
    %c0_18 = arith.constant 0 : index
    %28 = vector.load %arg7[%c0_17, %c0_18] : memref<1x128xf32, #tpu.memory_space<vmem>>, vector<1x128xf32>
    %29 = vector.broadcast %28 : vector<1x128xf32> to vector<8x128xf32>
    %30 = arith.addf %27, %29 : vector<8x128xf32>
    %cst_19 = arith.constant 5.000000e-01 : f32
    %31 = vector.broadcast %cst_19 : f32 to vector<8x128xf32>
    %32 = arith.mulf %31, %30 : vector<8x128xf32>
    %cst_20 = arith.constant 4.471500e-02 : f32
    %33 = vector.broadcast %cst_20 : f32 to vector<8x128xf32>
    %34 = arith.mulf %33, %30 : vector<8x128xf32>
    %35 = arith.mulf %34, %30 : vector<8x128xf32>
    %36 = arith.mulf %35, %30 : vector<8x128xf32>
    %37 = arith.addf %30, %36 : vector<8x128xf32>
    %cst_21 = arith.constant 0.797884583 : f32
    %38 = vector.broadcast %cst_21 : f32 to vector<8x128xf32>
    %39 = arith.mulf %38, %37 : vector<8x128xf32>
    %40 = math.tanh %39 : vector<8x128xf32>
    %cst_22 = arith.constant 1.000000e+00 : f32
    %41 = vector.broadcast %cst_22 : f32 to vector<8x128xf32>
    %42 = arith.addf %41, %40 : vector<8x128xf32>
    %43 = arith.mulf %32, %42 : vector<8x128xf32>
    %44 = arith.truncf %43 : vector<8x128xf32> to vector<8x128xbf16>
    %c0_23 = arith.constant 0 : index
    %c0_24 = arith.constant 0 : index
    %45 = vector.load %arg8[%c0_23, %c0_24] : memref<128x128xbf16, #tpu.memory_space<vmem>>, vector<128x128xbf16>
    %cst_25 = arith.constant dense<0.000000e+00> : vector<8x128xf32>
    %46 = tpu.matmul %44, %45, %cst_25 {dimension_numbers = #tpu.dot_dimension_numbers<[1], [0], [0], [1], [0, 0, 1, 1], [], []>} : vector<8x128xbf16>, vector<128x128xbf16>, vector<8x128xf32> -> vector<8x128xf32>
    %c0_26 = arith.constant 0 : index
    %c0_27 = arith.constant 0 : index
    %47 = vector.load %arg9[%c0_26, %c0_27] : memref<1x128xf32, #tpu.memory_space<vmem>>, vector<1x128xf32>
    %48 = vector.broadcast %47 : vector<1x128xf32> to vector<8x128xf32>
    %49 = arith.addf %46, %48 : vector<8x128xf32>
    %c0_28 = arith.constant 0 : index
    %c0_29 = arith.constant 0 : index
    %50 = vector.load %arg12[%c0_28, %c0_29] : memref<8x128xf32, #tpu.memory_space<vmem>>, vector<8x128xf32>
    tpu.vector_store %arg12[%c0_28, %c0_29], %49 {strides = array<i32>} : memref<8x128xf32, #tpu.memory_space<vmem>>, vector<8x128xf32>,
    %c0_30 = arith.constant 0 : index
    %c0_31 = arith.constant 0 : index
    %51 = vector.load %arg10[%c0_30, %c0_31] : memref<1x128xf32, #tpu.memory_space<vmem>>, vector<1x128xf32>
    %52 = vector.broadcast %51 : vector<1x128xf32> to vector<8x128xf32>
    %53 = arith.mulf %49, %52 : vector<8x128xf32>
    %cst_32 = arith.constant dense<0.000000e+00> : vector<8xf32>
    %54 = vector.multi_reduction <add>, %53, %cst_32 [1] : vector<8x128xf32> to vector<8xf32>
    %55 = vector.shape_cast %54 : vector<8xf32> to vector<8x1xf32>
    %c0_33 = arith.constant 0 : index
    %c0_34 = arith.constant 0 : index
    %56 = vector.load %arg11[%c0_33, %c0_34] : memref<8x1xf32, #tpu.memory_space<vmem>>, vector<8x1xf32>
    tpu.vector_store %arg11[%c0_33, %c0_34], %55 {strides = array<i32>} : memref<8x1xf32, #tpu.memory_space<vmem>>, vector<8x1xf32>,
    return
  }
  func.func @transform_0(%arg0: i32) -> (i32, i32) {
    %c0_i32 = arith.constant 0 : i32
    %c0_i32_0 = arith.constant 0 : i32
    return %arg0, %c0_i32 : i32, i32
  }
  func.func @transform_1(%arg0: i32) -> (i32, i32) {
    %c0_i32 = arith.constant 0 : i32
    %c0_i32_0 = arith.constant 0 : i32
    %c0_i32_1 = arith.constant 0 : i32
    return %c0_i32, %c0_i32_0 : i32, i32
  }
  func.func @transform_2(%arg0: i32) -> (i32, i32) {
    %c0_i32 = arith.constant 0 : i32
    %c0_i32_0 = arith.constant 0 : i32
    %c0_i32_1 = arith.constant 0 : i32
    return %c0_i32, %c0_i32_0 : i32, i32
  }
  func.func @transform_3(%arg0: i32) -> (i32, i32) {
    %c0_i32 = arith.constant 0 : i32
    %c0_i32_0 = arith.constant 0 : i32
    %c0_i32_1 = arith.constant 0 : i32
    return %c0_i32, %c0_i32_0 : i32, i32
  }
  func.func @transform_4(%arg0: i32) -> (i32, i32) {
    %c0_i32 = arith.constant 0 : i32
    %c0_i32_0 = arith.constant 0 : i32
    %c0_i32_1 = arith.constant 0 : i32
    return %c0_i32, %c0_i32_0 : i32, i32
  }
  func.func @transform_5(%arg0: i32) -> (i32, i32) {
    %c0_i32 = arith.constant 0 : i32
    %c0_i32_0 = arith.constant 0 : i32
    %c0_i32_1 = arith.constant 0 : i32
    return %c0_i32, %c0_i32_0 : i32, i32
  }
  func.func @transform_6(%arg0: i32) -> (i32, i32) {
    %c0_i32 = arith.constant 0 : i32
    %c0_i32_0 = arith.constant 0 : i32
    %c0_i32_1 = arith.constant 0 : i32
    return %c0_i32, %c0_i32_0 : i32, i32
  }
  func.func @transform_7(%arg0: i32) -> (i32, i32) {
    %c0_i32 = arith.constant 0 : i32
    %c0_i32_0 = arith.constant 0 : i32
    %c0_i32_1 = arith.constant 0 : i32
    return %c0_i32, %c0_i32_0 : i32, i32
  }
  func.func @transform_8(%arg0: i32) -> (i32, i32) {
    %c0_i32 = arith.constant 0 : i32
    %c0_i32_0 = arith.constant 0 : i32
    %c0_i32_1 = arith.constant 0 : i32
    return %c0_i32, %c0_i32_0 : i32, i32
  }
  func.func @transform_9(%arg0: i32) -> (i32, i32) {
    %c0_i32 = arith.constant 0 : i32
    %c0_i32_0 = arith.constant 0 : i32
    %c0_i32_1 = arith.constant 0 : i32
    return %c0_i32, %c0_i32_0 : i32, i32
  }
  func.func @transform_10(%arg0: i32) -> (i32, i32) {
    %c0_i32 = arith.constant 0 : i32
    %c0_i32_0 = arith.constant 0 : i32
    return %arg0, %c0_i32 : i32, i32
  }
  func.func @transform_11(%arg0: i32) -> (i32, i32) {
    %c0_i32 = arith.constant 0 : i32
    %c0_i32_0 = arith.constant 0 : i32
    return %arg0, %c0_i32 : i32, i32
  }
}

</mosaic_0001>

<bundles_post_ra>
// kernel: causal_prag_rating_head.1
= control target key start
LH: loop header
LB: loop body
LE: loop exit
PB: predicated region body
PF: predicated region fallthrough
CT: control target
= control target key end

     0   :  { %v752_v1 = vmov 0.0   ;;  %vm753_vm0 = vmmov 0   ;;  %s984_s0 = inlined_call_operand.vmem [shape: bf16[8,128], index: 0, kind: input, shape index: {}]   ;;  %s985_s1 = inlined_call_operand.vmem [shape: bf16[128,128], index: 1, kind: input, shape index: {}]   ;;  %s986_s2 = inlined_call_operand.vmem [shape: f32[1,128], index: 2, kind: input, shape index: {}]   ;;  %s987_s3 = inlined_call_operand.vmem [shape: bf16[128,128], index: 3, kind: input, shape index: {}]   ;;  %s988_s4 = inlined_call_operand.vmem [shape: f32[1,128], index: 4, kind: input, shape index: {}]   ;;  %s989_s5 = inlined_call_operand.vmem [shape: bf16[128,128], index: 5, kind: input, shape index: {}]   ;;  %s990_s6 = inlined_call_operand.vmem [shape: f32[1,128], index: 6, kind: input, shape index: {}]   ;;  %s991_s7 = inlined_call_operand.vmem [shape: bf16[128,128], index: 7, kind: input, shape index: {}]   ;;  %s992_s8 = inlined_call_operand.vmem [shape: f32[1,128], index: 8, kind: input, shape index: {}]   ;;  %s993_s9 = inlined_call_operand.vmem [shape: f32[1,128], index: 9, kind: input, shape index: {}]   ;;  %s994_s10 = inlined_call_operand.vmem [shape: f32[8,1], index: 10, kind: output, shape index: {0}]   ;;  %s995_s11 = inlined_call_operand.hbm [shape: f32[8,128], index: 11, kind: output, shape index: {1}]  }
   0x1   :  { %v692_v0 = vld [vmem:[%s985_s1] sm:$0xff]   ;;  %609 = vmatprep.subr.bf16.mxu0 %v752_v1  ;;  %629 = vmatprep.subr.bf16.mxu1 %v752_v1  ;;  %v693_v2 = vld [vmem:[%s985_s1 + $0x8] sm:$0xff]   ;;  %v694_v3 = vld [vmem:[%s985_s1 + $0x10] sm:$0xff]  }
   0x2   :  { %610 = vmatpush3.bf16.msra.mxu0 %v692_v0  ;;  %625 = vmatprep.mubr.msk.bf16.mxu0 %vm753_vm0, %v752_v1  ;;  %v695_v4 = vld [vmem:[%s985_s1 + $0x18] sm:$0xff]   ;;  %v700_v5 = vld [vmem:[%s987_s3] sm:$0xff]   ;;  %v697_v7 = vld [vmem:[%s985_s1 + $0x28] sm:$0xff]  }
   0x3   :  { %611 = vmatprep.subr.bf16.mxu0 %v752_v1  ;;  %645 = vmatprep.mubr.msk.bf16.mxu1 %vm753_vm0, %v752_v1  ;;  %v696_v6 = vld [vmem:[%s985_s1 + $0x20] sm:$0xff]   ;;  %v698_v8 = vld [vmem:[%s985_s1 + $0x30] sm:$0xff]  }
   0x4   :  { %630 = vmatpush3.bf16.msra.mxu1 %v700_v5 }
   0x5   :  { %631 = vmatprep.subr.bf16.mxu1 %v752_v1 }
   0x6   :  { %612 = vmatpush3.bf16.msra.mxu0 %v693_v2 }
   0x7   :  { %613 = vmatprep.subr.bf16.mxu0 %v752_v1 }
   0xa   :  { %614 = vmatpush3.bf16.msra.mxu0 %v694_v3 }
   0xb   :  { %615 = vmatprep.subr.bf16.mxu0 %v752_v1 }
   0xe   :  { %616 = vmatpush3.bf16.msra.mxu0 %v695_v4 }
   0xf   :  { %617 = vmatprep.subr.bf16.mxu0 %v752_v1 }
  0x12   :  { %618 = vmatpush3.bf16.msra.mxu0 %v696_v6 }
  0x13   :  { %619 = vmatprep.subr.bf16.mxu0 %v752_v1 }
  0x16   :  { %620 = vmatpush3.bf16.msra.mxu0 %v697_v7 }
  0x17   :  { %621 = vmatprep.subr.bf16.mxu0 %v752_v1 }
  0x18   :  { %17 = vsyncpa [#allocation3], 0  ;;  %v699_v9 = vld [vmem:[%s985_s1 + $0x38] sm:$0xff]   ;;  %v39_v10 = vld [vmem:[%s984_s0] sm:$0xf]  ;;  %s754_s23 = smov [#allocation2]  }
  0x19   :  { %v701_v11 = vld [vmem:[%s987_s3 + $0x8] sm:$0xff]   ;;  %v702_v12 = vld [vmem:[%s987_s3 + $0x10] sm:$0xff]   ;;  %v703_v13 = vld [vmem:[%s987_s3 + $0x18] sm:$0xff]  }
  0x1a   :  { %622 = vmatpush3.bf16.msra.mxu0 %v698_v8  ;;  %632 = vmatpush3.bf16.msra.mxu1 %v701_v11  ;;  %v704_v14 = vld [vmem:[%s987_s3 + $0x20] sm:$0xff]   ;;  %v705_v15 = vld [vmem:[%s987_s3 + $0x28] sm:$0xff]   ;;  %v706_v16 = vld [vmem:[%s987_s3 + $0x30] sm:$0xff]  }
  0x1b   :  { %623 = vmatprep.subr.bf16.mxu0 %v752_v1  ;;  %633 = vmatprep.subr.bf16.mxu1 %v752_v1  ;;  %v707_v17 = vld [vmem:[%s987_s3 + $0x38] sm:$0xff]   ;;  %v708_v18 = vld [vmem:[%s989_s5] sm:$0xff]   ;;  %v709_v19 = vld [vmem:[%s989_s5 + $0x8] sm:$0xff]  }
  0x1c   :  { %v710_v20 = vld [vmem:[%s989_s5 + $0x10] sm:$0xff]   ;;  %v711_v21 = vld [vmem:[%s989_s5 + $0x18] sm:$0xff]   ;;  %v712_v22 = vld [vmem:[%s989_s5 + $0x20] sm:$0xff]  }
  0x1d   :  { %v713_v23 = vld [vmem:[%s989_s5 + $0x28] sm:$0xff]   ;;  %v714_v24 = vld [vmem:[%s989_s5 + $0x30] sm:$0xff]   ;;  %v536_v25 = vld [vmem:[%s986_s2] ss:$0 sm:$0xff]  ;;  %s526_s2 = sshll.u32 %s754_s23, 4  ;;  %s527_s2 = int_to_ptr.vmem [resolvable:$true] %s526_s2 }
  0x1e   :  { %624 = vmatpush3.bf16.msra.mxu0 %v699_v9  ;;  %634 = vmatpush3.bf16.msra.mxu1 %v702_v12  ;;  %v715_v41 = vld [vmem:[%s989_s5 + $0x38] sm:$0xff]   ;;  %v716_v42 = vld [vmem:[%s991_s7] sm:$0xff]   ;;  %v717_v50 = vld [vmem:[%s991_s7 + $0x8] sm:$0xff]   ;;  %s728_s24 = scalar_lea.vmem %s527_s2, 128  ;;  %p733_p1 = scmp.lt.s32.totalorder %s527_s2, %s527_s2 }
  0x1f   :  { %649 = vmatprep.subr.bf16.mxu0 %v752_v1  ;;  %635 = vmatprep.subr.bf16.mxu1 %v752_v1  ;;  %v545_v43 = vld [vmem:[%s988_s4] ss:$0 sm:$0xff]  ;;  %v718_v51 = vld [vmem:[%s991_s7 + $0x10] sm:$0xff]   ;;  %v719_v52 = vld [vmem:[%s991_s7 + $0x18] sm:$0xff]   ;;  %p729_p0 = scmp.ne.s32.totalorder %s527_s2, %s728_s24  ;;  %p734_p2 = scmp.lt.s32.totalorder %s728_s24, %s728_s24 }
  0x20   :  { %v720_v53 = vld [vmem:[%s991_s7 + $0x20] sm:$0xff]   ;;  %v721_v54 = vld [vmem:[%s991_s7 + $0x28] sm:$0xff]   ;;  %v722_v55 = vld [vmem:[%s991_s7 + $0x30] sm:$0xff]  }
  0x21   :  { %626 = vmatmul.mubr.bf16.vlgmr.msra.gmra.mrb[0].mxu0 %v39_v10  ;;  %v723_v56 = vld [vmem:[%s991_s7 + $0x38] sm:$0xff]   ;;  %v554_v57 = vld [vmem:[%s990_s6] ss:$0 sm:$0xff]  ;;  %p735_p3 = por %p734_p2, %p733_p1 }
  0x22   :  { %665 = vmatprep.mubr.msk.bf16.mxu0 %vm753_vm0, %v752_v1  ;;  %636 = vmatpush3.bf16.msra.mxu1 %v703_v13  ;;  %v563_v9 = vld [vmem:[%s992_s8] ss:$0 sm:$0xff] }
  0x23   :  { %637 = vmatprep.subr.bf16.mxu1 %v752_v1  ;;  %650 = vmatpush3.bf16.msra.mxu0 %v708_v18  ;;  %v572_v11 = vld [vmem:[%s993_s9] ss:$0 sm:$0xff]  ;;  %p736_p4 = pnand %p735_p3, %p729_p0 }
  0x24   :  { %651 = vmatprep.subr.bf16.mxu0 %v752_v1 }
  0x26   :  { %638 = vmatpush3.bf16.msra.mxu1 %v704_v14 }
  0x27   :  { %639 = vmatprep.subr.bf16.mxu1 %v752_v1  ;;  %652 = vmatpush3.bf16.msra.mxu0 %v709_v19 }
  0x28   :  { %653 = vmatprep.subr.bf16.mxu0 %v752_v1 }
  0x2a   :  { %640 = vmatpush3.bf16.msra.mxu1 %v705_v15 }
  0x2b   :  { %641 = vmatprep.subr.bf16.mxu1 %v752_v1  ;;  %654 = vmatpush3.bf16.msra.mxu0 %v710_v20 }
  0x2c   :  { %655 = vmatprep.subr.bf16.mxu0 %v752_v1 }
  0x2e   :  { %642 = vmatpush3.bf16.msra.mxu1 %v706_v16 }
  0x2f   :  { %643 = vmatprep.subr.bf16.mxu1 %v752_v1  ;;  %656 = vmatpush3.bf16.msra.mxu0 %v711_v21 }
  0x30   :  { %657 = vmatprep.subr.bf16.mxu0 %v752_v1 }
  0x32   :  { %644 = vmatpush3.bf16.msra.mxu1 %v707_v17 }
  0x33   :  { %669 = vmatprep.subr.bf16.mxu1 %v752_v1  ;;  %658 = vmatpush3.bf16.msra.mxu0 %v712_v22 }
  0x34   :  { %659 = vmatprep.subr.bf16.mxu0 %v752_v1 }
  0x37   :  { %660 = vmatpush3.bf16.msra.mxu0 %v713_v23 }
  0x38   :  { %661 = vmatprep.subr.bf16.mxu0 %v752_v1 }
  0x3b   :  { %662 = vmatpush3.bf16.msra.mxu0 %v714_v24 }
  0x3c   :  { %663 = vmatprep.subr.bf16.mxu0 %v752_v1 }
  0x3f   :  { %664 = vmatpush3.bf16.msra.mxu0 %v715_v41 }
  0xf4   :  { %v145_v26 = vpop.f32.mrb[0].mxu0 }
  0xf5   :  { %v146_v27 = vadd.f32 %v536_v25, %v145_v26  ;;  %v627_v28 = vpop.f32.mrb[1].mxu0 }
  0xf6   :  { %v148_v29 = vpop.f32.mrb[2].mxu0 }
  0xf7   :  { %v152_v30 = vmul.f32 0.044715, %v146_v27  ;;  %v628_v31 = vpop.f32.mrb[3].mxu0  ;;  %v151_v37 = vmul.f32 0.5, %v146_v27 }
  0xf9   :  { %v153_v32 = vmul.f32 %v152_v30, %v146_v27 }
  0xfb   :  { %v154_v33 = vmul.f32 %v153_v32, %v146_v27 }
  0xfd   :  { %v155_v34 = vadd.f32 %v154_v33, %v146_v27 }
  0xff   :  { %v156_v35 = vmul.f32 0.7978846, %v155_v34 }
 0x101   :  { %724 = vtanh.f32 %v156_v35 }
 0x10b   :  { %v725_v36 = vpop.eup %724 }
 0x10c   :  { %v158_v38 = vadd.f32 1.0, %v725_v36 }
 0x10e   :  { %v159_v39 = vmul.f32 %v158_v38, %v151_v37 }
 0x110   :  { %v160_v40 = vpack.c.bf16 %v159_v39, %v159_v39 }
 0x112   :  { %646 = vmatmul.mubr.bf16.vlgmr.msra.gmra.mrb[0].mxu1 %v160_v40 }
 0x113   :  { %685 = vmatprep.mubr.msk.bf16.mxu1 %vm753_vm0, %v752_v1  ;;  %670 = vmatpush3.bf16.msra.mxu1 %v716_v42 }
 0x114   :  { %671 = vmatprep.subr.bf16.mxu1 %v752_v1 }
 0x117   :  { %672 = vmatpush3.bf16.msra.mxu1 %v717_v50 }
 0x118   :  { %673 = vmatprep.subr.bf16.mxu1 %v752_v1 }
 0x11b   :  { %674 = vmatpush3.bf16.msra.mxu1 %v718_v51 }
 0x11c   :  { %675 = vmatprep.subr.bf16.mxu1 %v752_v1 }
 0x11f   :  { %676 = vmatpush3.bf16.msra.mxu1 %v719_v52 }
 0x120   :  { %677 = vmatprep.subr.bf16.mxu1 %v752_v1 }
 0x123   :  { %678 = vmatpush3.bf16.msra.mxu1 %v720_v53 }
 0x124   :  { %679 = vmatprep.subr.bf16.mxu1 %v752_v1 }
 0x127   :  { %680 = vmatpush3.bf16.msra.mxu1 %v721_v54 }
 0x128   :  { %681 = vmatprep.subr.bf16.mxu1 %v752_v1 }
 0x12b   :  { %682 = vmatpush3.bf16.msra.mxu1 %v722_v55 }
 0x12c   :  { %683 = vmatprep.subr.bf16.mxu1 %v752_v1 }
 0x12f   :  { %684 = vmatpush3.bf16.msra.mxu1 %v723_v56 }
 0x1e5   :  { %v266_v44 = vpop.f32.mrb[0].mxu1 }
 0x1e6   :  { %v267_v45 = vadd.f32 %v545_v43, %v266_v44  ;;  %v647_v46 = vpop.f32.mrb[1].mxu1 }
 0x1e7   :  { %v269_v47 = vpop.f32.mrb[2].mxu1 }
 0x1e8   :  { %v272_v48 = vpack.c.bf16 %v267_v45, %v267_v45  ;;  %v648_v49 = vpop.f32.mrb[3].mxu1 }
 0x1ea   :  { %666 = vmatmul.mubr.bf16.vlgmr.msra.gmra.mrb[4].mxu0 %v272_v48 }
 0x2bd   :  { %v378_v58 = vpop.f32.mrb[4].mxu0 }
 0x2be   :  { %v379_v59 = vadd.f32 %v554_v57, %v378_v58  ;;  %v667_v60 = vpop.f32.mrb[5].mxu0 }
 0x2bf   :  { %v381_v61 = vpop.f32.mrb[6].mxu0 }
 0x2c0   :  { %v385_v62 = vmul.f32 0.044715, %v379_v59  ;;  %v668_v63 = vpop.f32.mrb[7].mxu0  ;;  %v384_v6 = vmul.f32 0.5, %v379_v59 }
 0x2c2   :  { %v386_v0 = vmul.f32 %v385_v62, %v379_v59 }
 0x2c4   :  { %v387_v2 = vmul.f32 %v386_v0, %v379_v59 }
 0x2c6   :  { %v388_v3 = vadd.f32 %v387_v2, %v379_v59 }
 0x2c8   :  { %v389_v4 = vmul.f32 0.7978846, %v388_v3 }
 0x2ca   :  { %726 = vtanh.f32 %v389_v4 }
 0x2d4   :  { %v727_v5 = vpop.eup %726 }
 0x2d5   :  { %v391_v7 = vadd.f32 1.0, %v727_v5 }
 0x2d7   :  { %v392_v1 = vmul.f32 %v391_v7, %v384_v6 }
 0x2d9   :  { %v393_v8 = vpack.c.bf16 %v392_v1, %v392_v1 }
 0x2db   :  { %686 = vmatmul.mubr.bf16.vlgmr.msra.gmra.mrb[4].mxu1 %v393_v8 }
 0x3ae   :  { %v499_v10 = vpop.f32.mrb[4].mxu1 }
 0x3af   :  { %v500_v12 = vadd.f32 %v563_v9, %v499_v10  ;;  %v687_v13 = vpop.f32.mrb[5].mxu1 }
 0x3b0   :  { %v502_v14 = vpop.f32.mrb[6].mxu1 }
 0x3b1   :  { %505 = vst [vmem:[#allocation2] sm:$0xff] %v500_v12  ;;  %v688_v15 = vpop.f32.mrb[7].mxu1  ;;  %v513_v16 = vmul.f32 %v572_v11, %v500_v12 }
 0x3b3   :  { %514 = vadd.xlane.f32.xlu0 %v513_v16 }
 0x3b4   :  { %739 = shalt.err (!%p736_p4)
}
 0x3b5   :  { %s740_s9 = scalar_lea.hbm %s995_s11, 128 }
 0x3b6   :  { %p741_p5 = scmp.ne.s32.totalorder %s995_s11, %s740_s9  ;;  %p744_p6 = scmp.lt.u32.totalorder %s740_s9, %s995_s11 }
 0x3b8   :  { %p746_p7 = pnand %p744_p6, %p741_p5 }
 0x3ba   :  { %749 = shalt.err (!%p746_p7)
}
 0x3bb   :  { %529 = dma.vmem_to_hbm [thread:$0]  %s527_s2, 128, %s995_s11, [#allocation3]   ;;  %vm516_vm1 = vcmask 7168  }
 0x440   :  { %v515_v17 = vpop.xlane.xlu0 %514 }
 0x441   :  { %517 = vst.msk [vmem:[%s994_s10] sm:$0xff] %vm516_vm1, %v515_v17 }
 0x442   :  { %750 = dma.done.wait [#allocation3], 128  }
 0x443   :  { %751 = vsyncadd [#allocation3], 4294967168 }
 0x444   :  { %535 = vsyncpa [#allocation3], 1 }

</bundles_post_ra>
